<compile_context>
chip_gen: v7x
topology: tpu7x:2x2x1
jax: 0.10.0
libtpu: 0.0.40
codegen_flags: <defaults>
</compile_context>

<pallas_src>
from functools import partial

import jax
import jax.numpy as jnp
from jax.experimental import pallas as pl
from jax.experimental.pallas import tpu as pltpu


def _round_up(x: int, m: int) -> int:
    return ((x + m - 1) // m) * m


def fastrnn_kernel(sab_ref, xh_ref, h_ref, wu_ref, bias_ref, out_ref):
    # Single fused MXU contraction over K = I_pad + H_pad for this output-column
    # tile. Weights arrive pre-concatenated in [K, tn] orientation -> no transpose.
    pre = jnp.dot(xh_ref[...], wu_ref[...],
                  preferred_element_type=jnp.float32)        # [tb, tn] f32
    pre = pre + bias_ref[...].astype(jnp.float32)            # broadcast [1, tn]

    c = jnp.tanh(pre)                                        # update nonlinearity (f32)

    sig_alpha = sab_ref[0]                                   # precomputed sigmoid(alpha)
    sig_beta = sab_ref[1]                                    # precomputed sigmoid(beta)

    new_h = sig_beta * h_ref[...].astype(jnp.float32) + sig_alpha * c
    out_ref[...] = new_h.astype(out_ref.dtype)


@partial(jax.jit, static_argnames=("use_bf16_matmul",))
def fastrnn_cell_forward(x, h, W, U, bias_update, alpha, beta, *,
                         use_bf16_matmul=False):
    """One FastRNN cell step. x: [B, I], h: [B, H], W: [I, H], U: [H, H]."""
    B, I = x.shape
    H = h.shape[1]
    out_dtype = x.dtype
    op_dtype = jnp.bfloat16 if use_bf16_matmul else x.dtype

    op_itemsize = jnp.dtype(op_dtype).itemsize
    out_itemsize = jnp.dtype(out_dtype).itemsize
    # Sublane packing for the matmul-operand dtype: 8 (f32) / 16 (bf16) / 32 (8-bit).
    sublane = {4: 8, 2: 16, 1: 32}.get(op_itemsize, 8)

    # ---- wrapper-side layout prep (one-time / tiny, keeps the kernel clean) ----
    H_pad = max(_round_up(H, 128), 128)          # lane-dense output & weight columns
    tn = 256 if (H_pad % 256 == 0) else 128      # output-column tile (MXU width on v6e/v7x)
    I_pad = max(_round_up(I, tn), tn)            # h starts at a tn-aligned column of xh
    K_pad = I_pad + H_pad                        # fused contraction length (multiple of 128)

    tb = 128 if B >= 128 else _round_up(B, sublane)   # batch tile (dtype sublane multiple)
    B_pad = _round_up(B, tb)

    # x||h with x padded to I_pad so h occupies columns [I_pad, I_pad+H).
    xh = jnp.zeros((B_pad, K_pad), op_dtype)
    xh = xh.at[:B, :I].set(x.astype(op_dtype))
    xh = xh.at[:B, I_pad:I_pad + H].set(h.astype(op_dtype))

    # Fused [W; U] with the same row layout as xh's columns.
    WU = jnp.zeros((K_pad, H_pad), op_dtype)
    WU = WU.at[:I, :H].set(W.astype(op_dtype))
    WU = WU.at[I_pad:I_pad + H, :H].set(U.astype(op_dtype))

    bias_p = jnp.zeros((1, H_pad), jnp.float32)
    bias_p = bias_p.at[:, :H].set(bias_update.astype(jnp.float32))

    # Precompute the two gating scalars; passed via SMEM.
    sab = jnp.concatenate([jax.nn.sigmoid(alpha).reshape(-1),
                           jax.nn.sigmoid(beta).reshape(-1)]).astype(jnp.float32)  # (2,)

    nb = B_pad // tb
    nh = H_pad // tn
    h_blk_off = I_pad // tn                      # block offset of h inside xh (K-axis)

    # Advisory cost model for the XLA scheduler.
    cost = pl.CostEstimate(
        flops=2 * B_pad * K_pad * H_pad,
        transcendentals=B_pad * H_pad,
        bytes_accessed=(B_pad * K_pad * op_itemsize      # xh matmul operand
                        + B_pad * H_pad * op_itemsize    # h epilogue tiles (re-read)
                        + K_pad * H_pad * op_itemsize    # fused weights
                        + H_pad * 4 + 8                  # bias + scalars
                        + B_pad * H_pad * out_itemsize), # output
    )

    # VMEM budget: double-buffered tiles + headroom, capped under v7x's 64 MiB/TC.
    vmem_est = 2 * (tb * K_pad * op_itemsize        # xh block
                    + tb * tn * op_itemsize         # h epilogue tile
                    + K_pad * tn * op_itemsize      # streamed weight column tile
                    + tn * 4                        # bias tile
                    + tb * tn * out_itemsize)       # output tile
    vmem_limit = int(min(max(2 * vmem_est + (4 << 20), 32 << 20), 56 << 20))

    out = pl.pallas_call(
        fastrnn_kernel,
        out_shape=jax.ShapeDtypeStruct((B_pad, H_pad), out_dtype),
        grid_spec=pltpu.PrefetchScalarGridSpec(
            num_scalar_prefetch=0,
            grid=(nb, nh),
            in_specs=[
                # [sigmoid(alpha), sigmoid(beta)] scalars in SMEM, untiled.
                pl.BlockSpec(memory_space=pltpu.MemorySpace.SMEM),
                # x||h batch tile; index depends only on i -> stays resident across j.
                pl.BlockSpec((tb, K_pad), lambda i, j: (i, 0)),
                # Epilogue h tile: same xh array, j-th 128/256-wide column tile of h.
                pl.BlockSpec((tb, tn), lambda i, j, o=h_blk_off: (i, o + j)),
                # Fused [W; U] weights streamed in output-column tiles.
                pl.BlockSpec((K_pad, tn), lambda i, j: (0, j)),
                # Bias column tile.
                pl.BlockSpec((1, tn), lambda i, j: (0, j)),
            ],
            out_specs=pl.BlockSpec((tb, tn), lambda i, j: (i, j)),
        ),
        compiler_params=pltpu.CompilerParams(
            # Both axes write disjoint output tiles -> shard across TCs on v7x.
            dimension_semantics=("parallel", "parallel"),
            vmem_limit_bytes=vmem_limit,
        ),
        cost_estimate=cost,
    )(sab, xh, xh, WU, bias_p)

    # NOTE: padded rows/cols are sliced off; do not alias the padded buffer as state.
    return out[:B, :H]


def fastrnn_reference(x, h, W, U, bias_update, alpha, beta):
    pre = x @ W + h @ U
    c = jnp.tanh(pre + bias_update)
    return jax.nn.sigmoid(beta) * h + jax.nn.sigmoid(alpha) * c


if __name__ == "__main__":
    alphaInit, betaInit = -3.0, 3.0   # module defaults

    def run_case(batch, input_size, hidden_size, use_bf16, atol, rtol, seed):
        key = jax.random.PRNGKey(seed)
        kx, kh, kw, ku = jax.random.split(key, 4)
        x = jax.random.normal(kx, (batch, input_size), dtype=jnp.float32)
        h0 = jax.random.normal(kh, (batch, hidden_size), dtype=jnp.float32)
        # Parameter init matching the module's __init__ (full-rank path).
        W = 0.1 * jax.random.normal(kw, (input_size, hidden_size), dtype=jnp.float32)
        U = 0.1 * jax.random.normal(ku, (hidden_size, hidden_size), dtype=jnp.float32)
        bias_update = jnp.ones((1, hidden_size), dtype=jnp.float32)
        alpha = alphaInit * jnp.ones((1, 1), dtype=jnp.float32)
        beta = betaInit * jnp.ones((1, 1), dtype=jnp.float32)

        new_h = fastrnn_cell_forward(x, h0, W, U, bias_update, alpha, beta,
                                     use_bf16_matmul=use_bf16)
        new_h = jax.block_until_ready(new_h)

        ref = fastrnn_reference(x, h0, W, U, bias_update, alpha, beta)
        assert new_h.shape == (batch, hidden_size)
        assert jnp.allclose(new_h, ref, atol=atol, rtol=rtol), (
            f"mismatch vs reference (B={batch}, I={input_size}, H={hidden_size}, "
            f"bf16={use_bf16})")

    # f32 path, single output-column tile (matches the module's small-cell regime).
    run_case(8, 16, 32, False, 1e-5, 1e-5, seed=0)
    # f32 path, multiple output-column tiles (exercises the streaming j grid axis).
    run_case(4, 20, 384, False, 1e-4, 1e-4, seed=1)
    # bf16 matmul operands (f32 accumulation + f32 epilogue math).
    run_case(8, 16, 32, True, 3e-2, 3e-2, seed=0)

    print("KERNEL_OK")
</pallas_src>

<mosaic_0001>
module attributes {stable_mosaic.version = 11 : i64} {
  func.func @fastrnn_kernel(%arg0: i32, %arg1: i32, %arg2: memref<2xf32, #tpu.memory_space<smem>>, %arg3: memref<8x256xf32, #tpu.memory_space<vmem>>, %arg4: memref<8x128xf32, #tpu.memory_space<vmem>>, %arg5: memref<256x128xf32, #tpu.memory_space<vmem>>, %arg6: memref<1x128xf32, #tpu.memory_space<vmem>>, %arg7: memref<8x128xf32, #tpu.memory_space<vmem>>) attributes {dimension_semantics = [#tpu.dimension_semantics<parallel>, #tpu.dimension_semantics<parallel>], iteration_bounds = array<i64: 1, 1>, scalar_prefetch = 0 : i64, scratch_operands = 0 : i64, tpu.core_type = #tpu.core_type<tc>, window_params = [{transform_indices = @transform_0, window_bounds = array<i64: 2>}, {transform_indices = @transform_1, window_bounds = array<i64: 8, 256>}, {transform_indices = @transform_2, window_bounds = array<i64: 8, 128>}, {transform_indices = @transform_3, window_bounds = array<i64: 256, 128>}, {transform_indices = @transform_4, window_bounds = array<i64: 1, 128>}, {transform_indices = @transform_5, window_bounds = array<i64: 8, 128>}]} {
    %c0 = arith.constant 0 : index
    %c0_0 = arith.constant 0 : index
    %0 = vector.load %arg3[%c0, %c0_0] : memref<8x256xf32, #tpu.memory_space<vmem>>, vector<8x256xf32>
    %c0_1 = arith.constant 0 : index
    %c0_2 = arith.constant 0 : index
    %1 = vector.load %arg5[%c0_1, %c0_2] : memref<256x128xf32, #tpu.memory_space<vmem>>, vector<256x128xf32>
    %cst = arith.constant dense<0.000000e+00> : vector<8x128xf32>
    %2 = tpu.matmul %0, %1, %cst {dimension_numbers = #tpu.dot_dimension_numbers<[1], [0], [0], [1], [0, 0, 1, 1], [], []>} : vector<8x256xf32>, vector<256x128xf32>, vector<8x128xf32> -> vector<8x128xf32>
    %c0_3 = arith.constant 0 : index
    %c0_4 = arith.constant 0 : index
    %3 = vector.load %arg6[%c0_3, %c0_4] : memref<1x128xf32, #tpu.memory_space<vmem>>, vector<1x128xf32>
    %4 = vector.broadcast %3 : vector<1x128xf32> to vector<8x128xf32>
    %5 = arith.addf %2, %4 : vector<8x128xf32>
    %6 = math.tanh %5 : vector<8x128xf32>
    %c0_5 = arith.constant 0 : index
    %7 = memref.load %arg2[%c0_5] : memref<2xf32, #tpu.memory_space<smem>>
    %c1 = arith.constant 1 : index
    %8 = memref.load %arg2[%c1] : memref<2xf32, #tpu.memory_space<smem>>
    %c0_6 = arith.constant 0 : index
    %c0_7 = arith.constant 0 : index
    %9 = vector.load %arg4[%c0_6, %c0_7] : memref<8x128xf32, #tpu.memory_space<vmem>>, vector<8x128xf32>
    %10 = vector.broadcast %8 : f32 to vector<8x128xf32>
    %11 = arith.mulf %10, %9 : vector<8x128xf32>
    %12 = vector.broadcast %7 : f32 to vector<8x128xf32>
    %13 = arith.mulf %12, %6 : vector<8x128xf32>
    %14 = arith.addf %11, %13 : vector<8x128xf32>
    %c0_8 = arith.constant 0 : index
    %c0_9 = arith.constant 0 : index
    %15 = vector.load %arg7[%c0_8, %c0_9] : memref<8x128xf32, #tpu.memory_space<vmem>>, vector<8x128xf32>
    tpu.vector_store %arg7[%c0_8, %c0_9], %14 {strides = array<i32>} : memref<8x128xf32, #tpu.memory_space<vmem>>, vector<8x128xf32>,
    return
  }
  func.func @transform_0(%arg0: i32, %arg1: i32) -> i32 {
    %c0_i32 = arith.constant 0 : i32
    %c0_i32_0 = arith.constant 0 : i32
    return %c0_i32 : i32
  }
  func.func @transform_1(%arg0: i32, %arg1: i32) -> (i32, i32) {
    %c0_i32 = arith.constant 0 : i32
    %c0_i32_0 = arith.constant 0 : i32
    return %arg0, %c0_i32 : i32, i32
  }
  func.func @transform_2(%arg0: i32, %arg1: i32) -> (i32, i32) {
    %c1_i32 = arith.constant 1 : i32
    %0 = arith.addi %c1_i32, %arg1 : i32
    %c0_i32 = arith.constant 0 : i32
    return %arg0, %0 : i32, i32
  }
  func.func @transform_3(%arg0: i32, %arg1: i32) -> (i32, i32) {
    %c0_i32 = arith.constant 0 : i32
    %c0_i32_0 = arith.constant 0 : i32
    return %c0_i32, %arg1 : i32, i32
  }
  func.func @transform_4(%arg0: i32, %arg1: i32) -> (i32, i32) {
    %c0_i32 = arith.constant 0 : i32
    %c0_i32_0 = arith.constant 0 : i32
    return %c0_i32, %arg1 : i32, i32
  }
  func.func @transform_5(%arg0: i32, %arg1: i32) -> (i32, i32) {
    %c0_i32 = arith.constant 0 : i32
    return %arg0, %arg1 : i32, i32
  }
}

</mosaic_0001>

<bundles_post_ra>
// kernel: fastrnn_cell_forward.1
= control target key start
LH: loop header
LB: loop body
LE: loop exit
PB: predicated region body
PF: predicated region fallthrough
CT: control target
= control target key end

     0   :  { %10 = vsyncpa [#allocation4], 0  ;;  %s460_s0 = inlined_call_operand.vmem [shape: f32[2], index: 0, kind: input, shape index: {}]   ;;  %s461_s1 = inlined_call_operand.vmem [shape: f32[8,256], index: 1, kind: input, shape index: {}, may-alias: {1,2}]   ;;  %s462_s2 = inlined_call_operand.vmem [shape: f32[8,256], index: 2, kind: input, shape index: {}, may-alias: {1,2}]   ;;  %s463_s3 = inlined_call_operand.vmem [shape: f32[256,128], index: 3, kind: input, shape index: {}]   ;;  %s464_s4 = inlined_call_operand.vmem [shape: f32[1,128], index: 4, kind: input, shape index: {}]   ;;  %s465_s5 = inlined_call_operand.hbm [shape: f32[8,128], index: 5, kind: output, shape index: {}]  }
   0x1   :  { %11 = vsyncpa [#allocation3], 0  ;;  %s18_s20 = sshll.u32 %s460_s0, 4  ;;  %s19_s20 = int_to_ptr.vmem [resolvable:$true] %s18_s20 }
   0x2   :  { %s267_s21 = scalar_lea.vmem %s19_s20, 16  ;;  %p272_p1 = scmp.lt.s32.totalorder %s19_s20, %s19_s20 }
   0x3   :  { %p268_p0 = scmp.ne.s32.totalorder %s19_s20, %s267_s21  ;;  %p273_p2 = scmp.lt.s32.totalorder %s267_s21, %s267_s21 }
   0x5   :  { %p274_p3 = por %p273_p2, %p272_p1 }
   0x7   :  { %p275_p4 = pnand %p274_p3, %p268_p0 }
   0x9   :  { %278 = shalt.err (!%p275_p4)
}
   0xa   :  { %s305_s22 = smov [#allocation2]  }
   0xb   :  { %21 = dma.vmem_to_smem %s19_s20, 16, %s305_s22, [#allocation4]  }
   0xc   :  { %301 = dma.done.wait [#allocation4], 16  }
   0xd   :  { %302 = vsyncadd [#allocation4], 4294967280 }
   0xe   :  { %39 = sfence }
   0xf   :  { %v69_v0 = vld [vmem:[%s463_s3 + $0x80] sm:$0xff]  ;;  %v70_v1 = vld [vmem:[%s463_s3 + $0x88] sm:$0xff]  ;;  %v71_v5 = vld [vmem:[%s463_s3 + $0x90] sm:$0xff]  ;;  %s194_s15 = sld [smem:[#allocation2 + $0x1]] }
  0x10   :  { %v53_v2 = vld [vmem:[%s463_s3] sm:$0xff]  ;;  %v231_v3 = vpack.c.bf16 %v70_v1, %v69_v0  ;;  %v54_v4 = vld [vmem:[%s463_s3 + $0x8] sm:$0xff]  ;;  %v72_v6 = vld [vmem:[%s463_s3 + $0x98] sm:$0xff] }
  0x11   :  { %v233_v7 = vpack.c.bf16 %v54_v4, %v53_v2  ;;  %v235_v8 = vpack.c.bf16 %v72_v6, %v71_v5  ;;  %v55_v9 = vld [vmem:[%s463_s3 + $0x10] sm:$0xff]  ;;  %v56_v10 = vld [vmem:[%s463_s3 + $0x18] sm:$0xff]  ;;  %v73_v11 = vld [vmem:[%s463_s3 + $0xa0] sm:$0xff] }
  0x12   :  { %232 = vmatprep.subr.bf16.mxu0 %v231_v3  ;;  %v74_v12 = vld [vmem:[%s463_s3 + $0xa8] sm:$0xff]  ;;  %v237_v13 = vpack.c.bf16 %v56_v10, %v55_v9  ;;  %v57_v15 = vld [vmem:[%s463_s3 + $0x20] sm:$0xff]  ;;  %v75_v17 = vld [vmem:[%s463_s3 + $0xb0] sm:$0xff] }
  0x13   :  { %234 = vmatpush3.bf16.msra.mxu0 %v233_v7  ;;  %v239_v14 = vpack.c.bf16 %v74_v12, %v73_v11  ;;  %v58_v16 = vld [vmem:[%s463_s3 + $0x28] sm:$0xff]  ;;  %v76_v18 = vld [vmem:[%s463_s3 + $0xb8] sm:$0xff]  ;;  %v59_v21 = vld [vmem:[%s463_s3 + $0x30] sm:$0xff] }
  0x14   :  { %236 = vmatprep.subr.bf16.mxu0 %v235_v8  ;;  %v241_v19 = vpack.c.bf16 %v58_v16, %v57_v15  ;;  %v243_v20 = vpack.c.bf16 %v76_v18, %v75_v17  ;;  %v60_v22 = vld [vmem:[%s463_s3 + $0x38] sm:$0xff]  ;;  %v77_v23 = vld [vmem:[%s463_s3 + $0xc0] sm:$0xff]  ;;  %v78_v24 = vld [vmem:[%s463_s3 + $0xc8] sm:$0xff] }
  0x15   :  { %v52_v25 = vld [vmem:[%s461_s1 + $0x8] sm:$0xff]  ;;  %v245_v26 = vpack.c.bf16 %v60_v22, %v59_v21  ;;  %v247_v27 = vpack.c.bf16 %v78_v24, %v77_v23  ;;  %v61_v28 = vld [vmem:[%s463_s3 + $0x40] sm:$0xff]  ;;  %v79_v30 = vld [vmem:[%s463_s3 + $0xd0] sm:$0xff]  ;;  %v166_v56 = vstv %s194_s15 }
  0x16   :  { %156 = vmatprep.mubr.f32.mxu0 %v52_v25  ;;  %v62_v29 = vld [vmem:[%s463_s3 + $0x48] sm:$0xff]  ;;  %v80_v31 = vld [vmem:[%s463_s3 + $0xd8] sm:$0xff]  ;;  %v63_v34 = vld [vmem:[%s463_s3 + $0x50] sm:$0xff] }
  0x17   :  { %238 = vmatpush3.bf16.msra.mxu0 %v237_v13  ;;  %v249_v32 = vpack.c.bf16 %v62_v29, %v61_v28  ;;  %v251_v33 = vpack.c.bf16 %v80_v31, %v79_v30  ;;  %v64_v35 = vld [vmem:[%s463_s3 + $0x58] sm:$0xff]  ;;  %v81_v36 = vld [vmem:[%s463_s3 + $0xe0] sm:$0xff]  ;;  %v82_v37 = vld [vmem:[%s463_s3 + $0xe8] sm:$0xff] }
  0x18   :  { %240 = vmatprep.subr.bf16.mxu0 %v239_v14  ;;  %v253_v38 = vpack.c.bf16 %v64_v35, %v63_v34  ;;  %v255_v39 = vpack.c.bf16 %v82_v37, %v81_v36  ;;  %v65_v40 = vld [vmem:[%s463_s3 + $0x60] sm:$0xff]  ;;  %v66_v41 = vld [vmem:[%s463_s3 + $0x68] sm:$0xff]  ;;  %v83_v42 = vld [vmem:[%s463_s3 + $0xf0] sm:$0xff] }
  0x19   :  { %v84_v43 = vld [vmem:[%s463_s3 + $0xf8] sm:$0xff]  ;;  %v257_v44 = vpack.c.bf16 %v66_v41, %v65_v40  ;;  %v67_v46 = vld [vmem:[%s463_s3 + $0x70] sm:$0xff]  ;;  %v51_v49 = vld [vmem:[%s461_s1] sm:$0xff]  ;;  %s306_s1 = smov [#allocation5]  }
  0x1a   :  { %v259_v45 = vpack.c.bf16 %v84_v43, %v83_v42  ;;  %v68_v47 = vld [vmem:[%s463_s3 + $0x78] sm:$0xff]  ;;  %v193_v51 = vld [vmem:[%s464_s4] ss:$0 sm:$0xff]  ;;  %s163_s3 = sld [smem:[#allocation2]]  ;;  %v195_v55 = vld [vmem:[%s462_s2 + $0x8] sm:$0xff]  ;;  %s178_s18 = sshll.u32 %s306_s1, 4  ;;  %s179_s18 = int_to_ptr.vmem [resolvable:$true] %s178_s18 }
  0x1b   :  { %242 = vmatpush3.bf16.msra.mxu0 %v241_v19  ;;  %v261_v48 = vpack.c.bf16 %v68_v47, %v67_v46  ;;  %v167_v58 = vmul.f32 %v195_v55, %v166_v56  ;;  %s279_s4 = scalar_lea.vmem %s179_s18, 128  ;;  %p284_p6 = scmp.lt.s32.totalorder %s179_s18, %s179_s18 }
  0x1c   :  { %244 = vmatprep.subr.bf16.mxu0 %v243_v20  ;;  %p280_p5 = scmp.ne.s32.totalorder %s179_s18, %s279_s4  ;;  %p285_p7 = scmp.lt.s32.totalorder %s279_s4, %s279_s4 }
  0x1e   :  { %p286_p8 = por %p285_p7, %p284_p6 }
  0x1f   :  { %246 = vmatpush3.bf16.msra.mxu0 %v245_v26 }
  0x20   :  { %248 = vmatprep.subr.bf16.mxu0 %v247_v27  ;;  %v168_v57 = vstv %s163_s3  ;;  %p287_p9 = pnand %p286_p8, %p280_p5 }
  0x23   :  { %250 = vmatpush3.bf16.msra.mxu0 %v249_v32 }
  0x24   :  { %252 = vmatprep.subr.bf16.mxu0 %v251_v33 }
  0x27   :  { %254 = vmatpush3.bf16.msra.mxu0 %v253_v38 }
  0x28   :  { %256 = vmatprep.subr.bf16.mxu0 %v255_v39 }
  0x2b   :  { %258 = vmatpush3.bf16.msra.mxu0 %v257_v44 }
  0x2c   :  { %260 = vmatprep.subr.bf16.mxu0 %v259_v45 }
  0x2f   :  { %262 = vmatpush3.bf16.msra.mxu0 %v261_v48 }
  0x32   :  { %157 = vmatmul.mubr.f32.vlgmr.msra.gmra.mrb[0].mxu0 %v51_v49 }
 0x105   :  { %v228_v50 = vpop.f32.mrb[0].mxu0 }
 0x106   :  { %v229_v52 = vpop.f32.mrb[1].mxu0 }
 0x107   :  { %v230_v53 = vadd.f32 %v229_v52, %v228_v50 }
 0x109   :  { %v159_v54 = vadd.f32 %v230_v53, %v193_v51 }
 0x10b   :  { %265 = vtanh.f32 %v159_v54 }
 0x115   :  { %v266_v59 = vpop.eup %265 }
 0x116   :  { %v169_v60 = vmul.f32 %v266_v59, %v168_v57 }
 0x118   :  { %v170_v61 = vadd.f32 %v169_v60, %v167_v58 }
 0x11a   :  { %171 = vst [vmem:[#allocation5] sm:$0xff] %v170_v61 }
 0x11b   :  { %290 = shalt.err (!%p287_p9)
}
 0x11c   :  { %s291_s2 = scalar_lea.hbm %s465_s5, 128 }
 0x11d   :  { %p292_p10 = scmp.ne.s32.totalorder %s465_s5, %s291_s2  ;;  %p295_p11 = scmp.lt.u32.totalorder %s291_s2, %s465_s5 }
 0x11f   :  { %p297_p12 = pnand %p295_p11, %p292_p10 }
 0x121   :  { %300 = shalt.err (!%p297_p12)
}
 0x122   :  { %181 = dma.vmem_to_hbm [thread:$0]  %s179_s18, 128, %s465_s5, [#allocation3]  }
 0x123   :  { %303 = dma.done.wait [#allocation3], 128  }
 0x124   :  { %304 = vsyncadd [#allocation3], 4294967168 }
 0x125   :  { %185 = vsyncpa [#allocation3], 1 }
 0x126   :  { %186 = vsyncpa [#allocation4], 1 }

</bundles_post_ra>
